<compile_context>
chip_gen: v5e
topology: v5e:2x2
jax: 0.10.0
libtpu: 0.0.40
codegen_flags: <defaults>
</compile_context>

<pallas_src>
import functools

import jax
import jax.numpy as jnp
from jax.experimental import pallas as pl
from jax.experimental.pallas import tpu as pltpu


def _smooth_ce_kernel(tgt_ref, pred_ref, out_ref, *, eps, n_valid):
    """One grid step over a (tile, C) slab of logits in native [N, C] layout.

    tgt_ref:  (tile, 1)  int32     target class id per sample (rows = samples)
    pred_ref: (tile, C)  f32/bf16  logits, classes on the lane axis
    out_ref:  (tile, 2)  f32       [:, 0] masked per-sample loss, [:, 1] count
    """
    x = pred_ref[...].astype(jnp.float32)                        # (tile, C)
    t, c = x.shape

    # Numerically stable log-softmax pieces along the class (lane) axis.
    m = jnp.max(x, axis=-1, keepdims=True)                       # (tile, 1)
    z = x - m
    lse = jnp.log(jnp.sum(jnp.exp(z), axis=-1, keepdims=True))   # (tile, 1)

    # Smoothed one-hot weights sum to 1 (for in-range targets), so
    #   loss = -sum_j w_j * (z_j - lse) = lse - sum_j w_j * z_j
    # i.e. a single weighted lane-reduce, no separate z_t / sum_z temps.
    w_on = 1.0 - eps
    w_off = (eps / (c - 1)) if c > 1 else 0.0                    # guard C == 1
    col = jax.lax.broadcasted_iota(jnp.int32, (t, c), 1)
    w = jnp.where(col == tgt_ref[...], w_on, w_off)              # (tile, C)
    loss = lse - jnp.sum(w * z, axis=-1, keepdims=True)          # (tile, 1)

    # Finite-mean mask; also mask rows past N. The ragged last block reads
    # whatever lies past the array, but all math here is per-row (no cross-row
    # reduction), so garbage tail rows cannot leak into valid samples.
    row = jax.lax.broadcasted_iota(jnp.int32, (t, 1), 0)
    keep = jnp.logical_and(pl.program_id(0) * t + row < n_valid,
                           jnp.isfinite(loss))

    out_ref[:, 0:1] = jnp.where(keep, loss, 0.0)
    out_ref[:, 1:2] = keep.astype(jnp.float32)


def smooth_ce_loss(pred, target, smoothing_ratio=0.1, *, tile_rows=None):
    """Label-smoothed CE with finite-mean reduction.

    pred: [N, C] float logits (any float dtype), target: [N] int class ids.
    Returns a scalar f32 loss.
    """
    N, C = pred.shape
    tgt = target.astype(jnp.int32).reshape(N, 1)     # free reshape, tiny array

    # ---- VMEM-aware tile sizing (no transpose / cast / pad in the wrapper) --
    try:
        phys_vmem = int(pltpu.get_tpu_info().vmem_capacity_bytes)
    except Exception:
        phys_vmem = 64 * 1024 * 1024                 # v7x worst case
    vmem_limit = int(min(phys_vmem // 2, 48 * 1024 * 1024))  # <=32 MiB on v7x

    padded_c = max(-(-C // 128) * 128, 128)          # lane-padded width in VMEM
    itemsize = pred.dtype.itemsize
    row_bytes = (2 * padded_c * itemsize             # double-buffered pred block
                 + 2 * 128 * 4                       # double-buffered (tile,1) i32 target
                 + 2 * 128 * 4                       # double-buffered (tile,2) f32 output
                 + 3 * padded_c * 4)                 # ~3 live f32 temps in the body
    budget = max(row_bytes * 8, vmem_limit - 4 * 1024 * 1024)
    tile = budget // row_bytes
    tile = (tile // 256) * 256 if tile >= 256 else max(8, (tile // 8) * 8)

    if tile_rows is not None:
        tile = max(8, (int(tile_rows) // 8) * 8)
    elif N >= 512:
        # Keep >= 2 grid steps so both v7x TensorCores (megacore) get work.
        tile = min(tile, max(256, ((N // 2 + 255) // 256) * 256))
    if tile >= N:
        tile = N                                     # single full-extent block
    num_tiles = pl.cdiv(N, tile)                     # ragged last block is fine

    kernel = functools.partial(
        _smooth_ce_kernel, eps=float(smoothing_ratio), n_valid=N)

    out = pl.pallas_call(
        kernel,
        out_shape=jax.ShapeDtypeStruct((N, 2), jnp.float32),
        grid_spec=pltpu.PrefetchScalarGridSpec(
            num_scalar_prefetch=0,
            grid=(num_tiles,),
            in_specs=[
                pl.BlockSpec((tile, 1), lambda i: (i, 0)),   # target ids
                pl.BlockSpec((tile, C), lambda i: (i, 0)),   # logits (native)
            ],
            out_specs=pl.BlockSpec((tile, 2), lambda i: (i, 0)),
        ),
        compiler_params=pltpu.CompilerParams(
            dimension_semantics=("parallel",),
            vmem_limit_bytes=vmem_limit,
        ),
    )(tgt, pred)

    # Tiny finite-mean reduction over the per-sample partials.
    return jnp.sum(out[:, 0]) / jnp.sum(out[:, 1])


def smooth_ce_loss_ref(pred, target, smoothing_ratio=0.1):
    """Pure-JAX reference mirroring the PyTorch module."""
    eps = smoothing_ratio
    n_class = pred.shape[1]
    one_hot = jax.nn.one_hot(target, n_class, dtype=jnp.float32)
    one_hot = one_hot * (1 - eps) + (1 - one_hot) * eps / (n_class - 1)
    log_prb = jax.nn.log_softmax(pred.astype(jnp.float32), axis=1)
    loss = -jnp.sum(one_hot * log_prb, axis=1)
    finite = jnp.isfinite(loss)
    return jnp.sum(jnp.where(finite, loss, 0.0)) / jnp.sum(finite)


if __name__ == "__main__":
    key = jax.random.PRNGKey(0)
    k1, k2, k3, k4 = jax.random.split(key, 4)

    # Case 1: small shapes consistent with the module (64 points, 16 classes).
    N, C = 64, 16
    pred = jax.random.normal(k1, (N, C), dtype=jnp.float32)
    target = jax.random.randint(k2, (N,), 0, C, dtype=jnp.int32)
    loss = jax.block_until_ready(smooth_ce_loss(pred, target, 0.1))
    ref = smooth_ce_loss_ref(pred, target, 0.1)
    assert jnp.allclose(loss, ref, rtol=1e-5, atol=1e-5), (loss, ref)

    # Case 2: multi-tile grid with a ragged last block (N not a tile multiple).
    N2, C2 = 300, 13
    pred2 = jax.random.normal(k3, (N2, C2), dtype=jnp.float32)
    target2 = jax.random.randint(k4, (N2,), 0, C2, dtype=jnp.int32)
    loss2 = jax.block_until_ready(
        smooth_ce_loss(pred2, target2, 0.1, tile_rows=128))
    ref2 = smooth_ce_loss_ref(pred2, target2, 0.1)
    assert jnp.allclose(loss2, ref2, rtol=1e-5, atol=1e-5), (loss2, ref2)

    # Case 3: bf16 logits stay bf16 end-to-end (no wrapper f32 cast).
    pred3 = pred.astype(jnp.bfloat16)
    loss3 = jax.block_until_ready(smooth_ce_loss(pred3, target, 0.1))
    ref3 = smooth_ce_loss_ref(pred3.astype(jnp.float32), target, 0.1)
    assert jnp.allclose(loss3, ref3, rtol=5e-2, atol=5e-2), (loss3, ref3)

    print("KERNEL_OK")
</pallas_src>

<mosaic_0001>
module attributes {stable_mosaic.version = 11 : i64} {
  func.func @_smooth_ce_kernel(%arg0: i32, %arg1: memref<64x1xi32, #tpu.memory_space<vmem>>, %arg2: memref<64x16xf32, #tpu.memory_space<vmem>>, %arg3: memref<64x2xf32, #tpu.memory_space<vmem>>) attributes {dimension_semantics = [#tpu.dimension_semantics<parallel>], iteration_bounds = array<i64: 1>, scalar_prefetch = 0 : i64, scratch_operands = 0 : i64, tpu.core_type = #tpu.core_type<tc>, window_params = [{transform_indices = @transform_0, window_bounds = array<i64: 64, 1>}, {transform_indices = @transform_1, window_bounds = array<i64: 64, 16>}, {transform_indices = @transform_2, window_bounds = array<i64: 64, 2>}]} {
    %c0 = arith.constant 0 : index
    %c0_0 = arith.constant 0 : index
    %0 = vector.load %arg2[%c0, %c0_0] : memref<64x16xf32, #tpu.memory_space<vmem>>, vector<64x16xf32>
    %cst = arith.constant dense<0xFF800000> : vector<64xf32>
    %1 = vector.multi_reduction <maximumf>, %0, %cst [1] : vector<64x16xf32> to vector<64xf32>
    %2 = vector.shape_cast %1 : vector<64xf32> to vector<64x1xf32>
    %3 = vector.broadcast %2 : vector<64x1xf32> to vector<64x16xf32>
    %4 = arith.subf %0, %3 : vector<64x16xf32>
    %5 = math.exp %4 : vector<64x16xf32>
    %cst_1 = arith.constant dense<0.000000e+00> : vector<64xf32>
    %6 = vector.multi_reduction <add>, %5, %cst_1 [1] : vector<64x16xf32> to vector<64xf32>
    %7 = vector.shape_cast %6 : vector<64xf32> to vector<64x1xf32>
    %8 = math.log %7 : vector<64x1xf32>
    %9 = tpu.iota {dimensions = array<i32: 1>} : vector<64x16xi32>
    %c0_2 = arith.constant 0 : index
    %c0_3 = arith.constant 0 : index
    %10 = vector.load %arg1[%c0_2, %c0_3] : memref<64x1xi32, #tpu.memory_space<vmem>>, vector<64x1xi32>
    %11 = vector.broadcast %10 : vector<64x1xi32> to vector<64x16xi32>
    %12 = arith.cmpi eq, %9, %11 : vector<64x16xi32>
    %cst_4 = arith.constant 0.899999976 : f32
    %cst_5 = arith.constant 0.00666666683 : f32
    %13 = vector.broadcast %cst_4 : f32 to vector<64x16xf32>
    %14 = vector.broadcast %cst_5 : f32 to vector<64x16xf32>
    %15 = arith.select %12, %13, %14 : vector<64x16xi1>, vector<64x16xf32>
    %16 = arith.mulf %15, %4 : vector<64x16xf32>
    %cst_6 = arith.constant dense<0.000000e+00> : vector<64xf32>
    %17 = vector.multi_reduction <add>, %16, %cst_6 [1] : vector<64x16xf32> to vector<64xf32>
    %18 = vector.shape_cast %17 : vector<64xf32> to vector<64x1xf32>
    %19 = arith.subf %8, %18 : vector<64x1xf32>
    %20 = tpu.iota {dimensions = array<i32: 0>} : vector<64x1xi32>
    %c64_i32 = arith.constant 64 : i32
    %21 = arith.muli %arg0, %c64_i32 : i32
    %22 = vector.broadcast %21 : i32 to vector<64x1xi32>
    %23 = arith.addi %22, %20 : vector<64x1xi32>
    %c64_i32_7 = arith.constant 64 : i32
    %24 = vector.broadcast %c64_i32_7 : i32 to vector<64x1xi32>
    %25 = arith.cmpi slt, %23, %24 : vector<64x1xi32>
    %26 = tpu.weird %19 : vector<64x1xf32> -> vector<64x1xi1>
    %cst_8 = arith.constant dense<true> : vector<64x1xi1>
    %27 = arith.xori %26, %cst_8 : vector<64x1xi1>
    %28 = arith.andi %25, %27 : vector<64x1xi1>
    %cst_9 = arith.constant 0.000000e+00 : f32
    %29 = vector.broadcast %cst_9 : f32 to vector<64x1xf32>
    %30 = arith.select %28, %19, %29 : vector<64x1xi1>, vector<64x1xf32>
    %c0_10 = arith.constant 0 : index
    %c0_11 = arith.constant 0 : index
    %31 = vector.load %arg3[%c0_10, %c0_11] : memref<64x2xf32, #tpu.memory_space<vmem>>, vector<64x1xf32>
    tpu.vector_store %arg3[%c0_10, %c0_11], %30 {strides = array<i32>} : memref<64x2xf32, #tpu.memory_space<vmem>>, vector<64x1xf32>,
    %32 = arith.extui %28 : vector<64x1xi1> to vector<64x1xi32>
    %33 = arith.sitofp %32 : vector<64x1xi32> to vector<64x1xf32>
    %c0_12 = arith.constant 0 : index
    %c1 = arith.constant 1 : index
    %34 = vector.load %arg3[%c0_12, %c1] : memref<64x2xf32, #tpu.memory_space<vmem>>, vector<64x1xf32>
    tpu.vector_store %arg3[%c0_12, %c1], %33 {strides = array<i32>} : memref<64x2xf32, #tpu.memory_space<vmem>>, vector<64x1xf32>,
    return
  }
  func.func @transform_0(%arg0: i32) -> (i32, i32) {
    %c0_i32 = arith.constant 0 : i32
    %c0_i32_0 = arith.constant 0 : i32
    return %arg0, %c0_i32 : i32, i32
  }
  func.func @transform_1(%arg0: i32) -> (i32, i32) {
    %c0_i32 = arith.constant 0 : i32
    %c0_i32_0 = arith.constant 0 : i32
    return %arg0, %c0_i32 : i32, i32
  }
  func.func @transform_2(%arg0: i32) -> (i32, i32) {
    %c0_i32 = arith.constant 0 : i32
    %c0_i32_0 = arith.constant 0 : i32
    return %arg0, %c0_i32 : i32, i32
  }
}

</mosaic_0001>

<bundles_post_ra>
// kernel: tpu_custom_call.1
= control target key start
LH: loop header
LB: loop body
LE: loop exit
PB: predicated region body
PF: predicated region fallthrough
CT: control target
= control target key end

     0   :  { %vm19_vm0 = vcmask 130048   ;;  %v342_v3 = vmov 0   ;;  %v108_v57 = vlaneseq  ;;  %v343_v63 = vmov 0.006666667   ;;  %s533_s1 = inlined_call_operand.vmem [shape: f32[64,16], index: 1, kind: input, shape index: {}]   ;;  %s534_s0 = inlined_call_operand.vmem [shape: s32[64,1], index: 0, kind: input, shape index: {}]   ;;  %s535_s2 = inlined_call_operand.vmem [shape: f32[64,2], index: 2, kind: output, shape index: {}]  }
   0x1   :  { %v15_v0 = vld [vmem:[%s533_s1 + $0x20] sm:$0xff]  ;;  %v367_v1 = vld [vmem:[%s533_s1 + $0x10] sm:$0xff]  ;;  %309 = vset.pattern.permute.xlu0 %v342_v3  ;;  %308 = vset.pattern.permute.xlu2 %v342_v3  ;;  %v379_v7 = vld [vmem:[%s533_s1 + $0x28] sm:$0xff]  ;;  %vm257_vm9 = vcmask 7168   ;;  %vm344_vm12 = vmmov 1   ;;  %vm282_vm14 = vcmask 15368  }
   0x2   :  { %v11_v2 = vld [vmem:[%s533_s1] sm:$0xff]  ;;  %v32_v4 = vsel %vm19_vm0, %v15_v0, -inf  ;;  %v26_v5 = vsel %vm19_vm0, %v367_v1, -inf  ;;  %307 = vset.pattern.permute.xlu1 %v342_v3  ;;  %v14_v8 = vld [vmem:[%s533_s1 + $0x18] sm:$0xff]  ;;  %v12_v9 = vld [vmem:[%s533_s1 + $0x8] sm:$0xff]  ;;  %v35_v10 = vsel %vm19_vm0, %v379_v7, -inf }
   0x3   :  { %v20_v6 = vsel %vm19_vm0, %v11_v2, -inf  ;;  %33 = vmax.xlane.f32.xlu2 %v32_v4  ;;  %27 = vmax.xlane.f32.xlu1 %v26_v5  ;;  %v29_v11 = vsel %vm19_vm0, %v14_v8, -inf  ;;  %v23_v12 = vsel %vm19_vm0, %v12_v9, -inf  ;;  %v18_v13 = vld [vmem:[%s533_s1 + $0x38] sm:$0xff]  ;;  %v17_v14 = vld [vmem:[%s533_s1 + $0x30] sm:$0xff]  ;;  %v111_v17 = vld [vmem:[%s534_s0 + $0x8] sm:$0xff] }
   0x4   :  { %21 = vmax.xlane.f32.xlu0 %v20_v6  ;;  %v41_v15 = vsel %vm19_vm0, %v18_v13, -inf  ;;  %v38_v16 = vsel %vm19_vm0, %v17_v14, -inf  ;;  %v112_v18 = vld [vmem:[%s534_s0 + $0x10] sm:$0xff]  ;;  %v113_v19 = vld [vmem:[%s534_s0 + $0x18] sm:$0xff]  ;;  %v110_v20 = vld [vmem:[%s534_s0] sm:$0xff]  ;;  %v109_v58 = vand.u32 127, %v108_v57 }
   0x5   :  { %v115_v21 = vld [vmem:[%s534_s0 + $0x28] sm:$0xff]  ;;  %v114_v22 = vld [vmem:[%s534_s0 + $0x20] sm:$0xff]  ;;  %v117_v23 = vld [vmem:[%s534_s0 + $0x38] sm:$0xff] }
   0x6   :  { %v116_v24 = vld [vmem:[%s534_s0 + $0x30] sm:$0xff] }
   0xb   :  { %36 = vmax.xlane.f32.xlu2 %v35_v10  ;;  %30 = vmax.xlane.f32.xlu1 %v29_v11 }
   0xc   :  { %24 = vmax.xlane.f32.xlu0 %v23_v12 }
  0x13   :  { %42 = vmax.xlane.f32.xlu1 %v41_v15 }
  0x14   :  { %39 = vmax.xlane.f32.xlu0 %v38_v16 }
  0x23   :  { %122 = vperm.xlu2 %308, %v111_v17  }
  0x28   :  { %125 = vperm.xlu0 %309, %v112_v18  }
  0x2b   :  { %128 = vperm.xlu2 %308, %v113_v19  }
  0x2c   :  { %119 = vperm.xlu1 %307, %v110_v20  }
  0x33   :  { %134 = vperm.xlu2 %308, %v115_v21  }
  0x34   :  { %131 = vperm.xlu1 %307, %v114_v22  }
  0x3b   :  { %140 = vperm.xlu2 %308, %v117_v23  }
  0x3c   :  { %137 = vperm.xlu1 %307, %v116_v24  }
  0x76   :  { %v34_v25 = vpop.xlane.xlu2 %33  ;;  %v28_v26 = vpop.xlane.xlu1 %27 }
  0x77   :  { %v22_v27 = vpop.xlane.xlu0 %21  ;;  %v425_v35 = vsub.f32 %v15_v0, %v34_v25  ;;  %v46_v60 = vsub.f32 %v367_v1, %v28_v26 }
  0x78   :  { %v44_v28 = vsub.f32 %v11_v2, %v22_v27 }
  0x79   :  { %v60_v40 = vmul.f32 1.442695, %v425_v35  ;;  %v56_v5 = vmul.f32 1.442695, %v46_v60 }
  0x7a   :  { %v52_v29 = vmul.f32 1.442695, %v44_v28 }
  0x7c   :  { %310 = vpow2.f32 %v52_v29 }
  0x7e   :  { %v37_v30 = vpop.xlane.xlu2 %36  ;;  %v31_v31 = vpop.xlane.xlu1 %30 }
  0x7f   :  { %v423_v32 = vsub.f32 %v14_v8, %v31_v31  ;;  %v25_v33 = vpop.xlane.xlu0 %24  ;;  %v49_v11 = vsub.f32 %v379_v7, %v37_v30 }
  0x80   :  { %v45_v34 = vsub.f32 %v12_v9, %v25_v33 }
  0x81   :  { %v58_v36 = vmul.f32 1.442695, %v423_v32  ;;  %v62_v15 = vmul.f32 1.442695, %v49_v11 }
  0x82   :  { %v54_v37 = vmul.f32 1.442695, %v45_v34  ;;  %v311_v38 = vpop.eup %310 }
  0x83   :  { %312 = vpow2.f32 %v58_v36  ;;  %v68_v39 = vsel %vm19_vm0, %v311_v38, 0.0 }
  0x84   :  { %314 = vpow2.f32 %v54_v37  ;;  %69 = vadd.xlane.f32.xlu2 %v68_v39 }
  0x85   :  { %316 = vpow2.f32 %v60_v40 }
  0x86   :  { %v43_v42 = vpop.xlane.xlu1 %42  ;;  %v123_v43 = vpop.permute.xlu2 %122 }
  0x87   :  { %v40_v41 = vpop.xlane.xlu0 %39  ;;  %v51_v48 = vsub.f32 %v18_v13, %v43_v42  ;;  %vm143_vm1 = vcmp.eq.s32.totalorder %v109_v58, %v123_v43 }
  0x88   :  { %v430_v44 = vsub.f32 %v17_v14, %v40_v41  ;;  %v151_v3 = vsel %vm143_vm1, 0.9, %v343_v63 }
  0x89   :  { %v313_v45 = vpop.eup %312  ;;  %v66_v52 = vmul.f32 1.442695, %v51_v48  ;;  %v159_v10 = vmul.f32 %v151_v3, %v45_v34 }
  0x8a   :  { %v64_v46 = vmul.f32 1.442695, %v430_v44  ;;  %v315_v47 = vpop.eup %314  ;;  %v77_v49 = vsel %vm19_vm0, %v313_v45, 0.0 }
  0x8b   :  { %v71_v50 = vsel %vm19_vm0, %v315_v47, 0.0  ;;  %v317_v51 = vpop.eup %316  ;;  %v169_v13 = vsel %vm19_vm0, %v159_v10, 0.0 }
  0x8c   :  { %318 = vpow2.f32 %v64_v46  ;;  %72 = vadd.xlane.f32.xlu0 %v71_v50  ;;  %78 = vadd.xlane.f32.xlu2 %v77_v49  ;;  %v80_v55 = vsel %vm19_vm0, %v317_v51, 0.0 }
  0x8d   :  { %320 = vpow2.f32 %v66_v52 }
  0x8e   :  { %v129_v54 = vpop.permute.xlu2 %128  ;;  %322 = vpow2.f32 %v56_v5 }
  0x8f   :  { %324 = vpow2.f32 %v62_v15  ;;  %vm145_vm7 = vcmp.eq.s32.totalorder %v109_v58, %v129_v54 }
  0x90   :  { %v153_v29 = vsel %vm145_vm7, 0.9, %v343_v63 }
  0x91   :  { %v161_v31 = vmul.f32 %v153_v29, %v423_v32 }
  0x92   :  { %v319_v53 = vpop.eup %318 }
  0x93   :  { %v86_v56 = vsel %vm19_vm0, %v319_v53, 0.0  ;;  %v321_v59 = vpop.eup %320  ;;  %v175_v33 = vsel %vm19_vm0, %v161_v31, 0.0 }
  0x94   :  { %81 = vadd.xlane.f32.xlu0 %v80_v55  ;;  %87 = vadd.xlane.f32.xlu2 %v86_v56  ;;  %v89_v2 = vsel %vm19_vm0, %v321_v59, 0.0  ;;  %v323_v18 = vpop.eup %322  ;;  %v345_v55 = vmov 0.0  }
  0x95   :  { %v74_v7 = vsel %vm19_vm0, %v323_v18, 0.0  ;;  %v325_v26 = vpop.eup %324 }
  0x96   :  { %v135_v62 = vpop.permute.xlu2 %134  ;;  %v83_v27 = vsel %vm19_vm0, %v325_v26, 0.0 }
  0x97   :  { %vm147_vm4 = vcmp.eq.s32.totalorder %v109_v58, %v135_v62 }
  0x98   :  { %v155_v14 = vsel %vm147_vm4, 0.9, %v343_v63 }
  0x99   :  { %v163_v20 = vmul.f32 %v155_v14, %v49_v11 }
  0x9a   :  { %v126_v61 = vpop.permute.xlu0 %125 }
  0x9b   :  { %vm144_vm2 = vcmp.eq.s32.totalorder %v109_v58, %v126_v61  ;;  %v181_v24 = vsel %vm19_vm0, %v163_v20, 0.0 }
  0x9c   :  { %v152_v0 = vsel %vm144_vm2, 0.9, %v343_v63  ;;  %90 = vadd.xlane.f32.xlu0 %v89_v2 }
  0x9d   :  { %v160_v4 = vmul.f32 %v152_v0, %v46_v60 }
  0x9e   :  { %v120_v6 = vpop.permute.xlu1 %119  ;;  %v141_v16 = vpop.permute.xlu2 %140 }
  0x9f   :  { %vm142_vm3 = vcmp.eq.s32.totalorder %v109_v58, %v120_v6  ;;  %v172_v8 = vsel %vm19_vm0, %v160_v4, 0.0  ;;  %vm149_vm6 = vcmp.eq.s32.totalorder %v109_v58, %v141_v16 }
  0xa0   :  { %v150_v9 = vsel %vm142_vm3, 0.9, %v343_v63  ;;  %173 = vadd.xlane.f32.xlu2 %v172_v8  ;;  %v157_v23 = vsel %vm149_vm6, 0.9, %v343_v63 }
  0xa1   :  { %v158_v1 = vmul.f32 %v150_v9, %v44_v28  ;;  %v165_v25 = vmul.f32 %v157_v23, %v51_v48 }
  0xa3   :  { %v166_v12 = vsel %vm19_vm0, %v158_v1, 0.0  ;;  %v187_v28 = vsel %vm19_vm0, %v165_v25, 0.0 }
  0xa4   :  { %167 = vadd.xlane.f32.xlu1 %v166_v12  ;;  %170 = vadd.xlane.f32.xlu0 %v169_v13 }
  0xa6   :  { %v132_v17 = vpop.permute.xlu1 %131 }
  0xa7   :  { %vm146_vm5 = vcmp.eq.s32.totalorder %v109_v58, %v132_v17 }
  0xa8   :  { %v154_v19 = vsel %vm146_vm5, 0.9, %v343_v63 }
  0xa9   :  { %v162_v21 = vmul.f32 %v154_v19, %v425_v35 }
  0xab   :  { %v178_v22 = vsel %vm19_vm0, %v162_v21, 0.0 }
  0xac   :  { %75 = vadd.xlane.f32.xlu1 %v74_v7  ;;  %179 = vadd.xlane.f32.xlu2 %v178_v22 }
  0xad   :  { %182 = vadd.xlane.f32.xlu0 %v181_v24 }
  0xae   :  { %v138_v30 = vpop.permute.xlu1 %137 }
  0xaf   :  { %vm148_vm8 = vcmp.eq.s32.totalorder %v109_v58, %v138_v30 }
  0xb0   :  { %v156_v34 = vsel %vm148_vm8, 0.9, %v343_v63 }
  0xb1   :  { %v164_v35 = vmul.f32 %v156_v34, %v430_v44 }
  0xb3   :  { %v184_v36 = vsel %vm19_vm0, %v164_v35, 0.0 }
  0xb4   :  { %84 = vadd.xlane.f32.xlu1 %v83_v27  ;;  %188 = vadd.xlane.f32.xlu2 %v187_v28 }
  0xbc   :  { %176 = vadd.xlane.f32.xlu1 %v175_v33 }
  0xc4   :  { %185 = vadd.xlane.f32.xlu1 %v184_v36 }
  0xf7   :  { %v70_v37 = vpop.xlane.xlu2 %69 }
  0xff   :  { %v73_v38 = vpop.xlane.xlu0 %72  ;;  %v79_v39 = vpop.xlane.xlu2 %78 }
 0x100   :  { %326 = vlog2.f32 %v73_v38 }
 0x101   :  { %328 = vlog2.f32 %v70_v37 }
 0x106   :  { %v327_v43 = vpop.eup %326 }
 0x107   :  { %v82_v40 = vpop.xlane.xlu0 %81  ;;  %v88_v41 = vpop.xlane.xlu2 %87  ;;  %v95_v45 = vmul.f32 0.6931472, %v327_v43 }
 0x108   :  { %v329_v32 = vpop.eup %328  ;;  %330 = vlog2.f32 %v82_v40 }
 0x109   :  { %v93_v46 = vmul.f32 0.6931472, %v329_v32 }
 0x10e   :  { %v331_v50 = vpop.eup %330 }
 0x10f   :  { %v91_v42 = vpop.xlane.xlu0 %90  ;;  %v101_v52 = vmul.f32 0.6931472, %v331_v50 }
 0x110   :  { %332 = vlog2.f32 %v91_v42 }
 0x113   :  { %v174_v47 = vpop.xlane.xlu2 %173 }
 0x116   :  { %v333_v61 = vpop.eup %332 }
 0x117   :  { %v168_v48 = vpop.xlane.xlu1 %167  ;;  %v171_v49 = vpop.xlane.xlu0 %170  ;;  %v107_v2 = vmul.f32 0.6931472, %v333_v61 }
 0x118   :  { %v190_v44 = vsub.f32 %v93_v46, %v168_v48  ;;  %v191_v51 = vsub.f32 %v95_v45, %v171_v49 }
 0x11a   :  { %vm225_vm10 = vweird.f32 %v190_v44  ;;  %vm226_vm11 = vweird.f32 %v191_v51 }
 0x11b   :  { %vm233_vm13 = vmxor %vm225_vm10, %vm344_vm12 }
 0x11c   :  { %vm234_vm15 = vmxor %vm226_vm11, %vm344_vm12  ;;  %v249_v53 = vsel %vm233_vm13, %v190_v44, 0.0  ;;  %v295_v57 = vsel %vm233_vm13, 1.0, %v345_v55 }
 0x11d   :  { %v250_v54 = vsel %vm234_vm15, %v191_v51, 0.0  ;;  %v296_v56 = vsel %vm234_vm15, 1.0, %v345_v55  ;;  %258 = vst.msk [vmem:[%s535_s2] sm:$0xff] %vm257_vm9, %v249_v53 }
 0x11e   :  { %259 = vst.msk [vmem:[%s535_s2 + $0x8] sm:$0xff] %vm257_vm9, %v250_v54 }
 0x11f   :  { %284 = vst.msk [vmem:[%s535_s2 + $0x8] sm:$0xff] %vm282_vm14, %v296_v56  ;;  %v180_v58 = vpop.xlane.xlu2 %179  ;;  %v76_v59 = vpop.xlane.xlu1 %75 }
 0x120   :  { %283 = vst.msk [vmem:[%s535_s2] sm:$0xff] %vm282_vm14, %v295_v57  ;;  %v194_v60 = vsub.f32 %v101_v52, %v180_v58  ;;  %334 = vlog2.f32 %v76_v59  ;;  %v183_v17 = vpop.xlane.xlu0 %182 }
 0x121   :  { %336 = vlog2.f32 %v79_v39 }
 0x122   :  { %vm229_vm0 = vweird.f32 %v194_v60 }
 0x123   :  { %vm237_vm1 = vmxor %vm229_vm0, %vm344_vm12 }
 0x124   :  { %v253_v62 = vsel %vm237_vm1, %v194_v60, 0.0  ;;  %v299_v63 = vsel %vm237_vm1, 1.0, %v345_v55 }
 0x125   :  { %262 = vst.msk [vmem:[%s535_s2 + $0x20] sm:$0xff] %vm257_vm9, %v253_v62 }
 0x126   :  { %v335_v0 = vpop.eup %334  ;;  %287 = vst.msk [vmem:[%s535_s2 + $0x20] sm:$0xff] %vm282_vm14, %v299_v63 }
 0x127   :  { %v97_v3 = vmul.f32 0.6931472, %v335_v0  ;;  %v189_v4 = vpop.xlane.xlu2 %188  ;;  %v85_v5 = vpop.xlane.xlu1 %84 }
 0x128   :  { %v197_v6 = vsub.f32 %v107_v2, %v189_v4  ;;  %338 = vlog2.f32 %v85_v5  ;;  %v337_v9 = vpop.eup %336 }
 0x129   :  { %v192_v8 = vsub.f32 %v97_v3, %v174_v47  ;;  %340 = vlog2.f32 %v88_v41  ;;  %v99_v14 = vmul.f32 0.6931472, %v337_v9 }
 0x12a   :  { %vm232_vm2 = vweird.f32 %v197_v6 }
 0x12b   :  { %vm227_vm3 = vweird.f32 %v192_v8  ;;  %vm240_vm4 = vmxor %vm232_vm2, %vm344_vm12 }
 0x12c   :  { %vm235_vm5 = vmxor %vm227_vm3, %vm344_vm12  ;;  %v256_v10 = vsel %vm240_vm4, %v197_v6, 0.0  ;;  %v302_v12 = vsel %vm240_vm4, 1.0, %v345_v55 }
 0x12d   :  { %v251_v1 = vsel %vm235_vm5, %v192_v8, 0.0  ;;  %v297_v11 = vsel %vm235_vm5, 1.0, %v345_v55  ;;  %265 = vst.msk [vmem:[%s535_s2 + $0x38] sm:$0xff] %vm257_vm9, %v256_v10 }
 0x12e   :  { %v339_v13 = vpop.eup %338  ;;  %260 = vst.msk [vmem:[%s535_s2 + $0x10] sm:$0xff] %vm257_vm9, %v251_v1 }
 0x12f   :  { %285 = vst.msk [vmem:[%s535_s2 + $0x10] sm:$0xff] %vm282_vm14, %v297_v11  ;;  %v103_v15 = vmul.f32 0.6931472, %v339_v13  ;;  %v177_v16 = vpop.xlane.xlu1 %176  ;;  %v341_v20 = vpop.eup %340 }
 0x130   :  { %290 = vst.msk [vmem:[%s535_s2 + $0x38] sm:$0xff] %vm282_vm14, %v302_v12  ;;  %v193_v18 = vsub.f32 %v99_v14, %v177_v16  ;;  %v105_v24 = vmul.f32 0.6931472, %v341_v20 }
 0x131   :  { %v195_v19 = vsub.f32 %v103_v15, %v183_v17 }
 0x132   :  { %vm228_vm6 = vweird.f32 %v193_v18 }
 0x133   :  { %vm230_vm7 = vweird.f32 %v195_v19  ;;  %vm236_vm8 = vmxor %vm228_vm6, %vm344_vm12 }
 0x134   :  { %vm238_vm10 = vmxor %vm230_vm7, %vm344_vm12  ;;  %v252_v21 = vsel %vm236_vm8, %v193_v18, 0.0  ;;  %v298_v23 = vsel %vm236_vm8, 1.0, %v345_v55 }
 0x135   :  { %v254_v7 = vsel %vm238_vm10, %v195_v19, 0.0  ;;  %v300_v22 = vsel %vm238_vm10, 1.0, %v345_v55  ;;  %261 = vst.msk [vmem:[%s535_s2 + $0x18] sm:$0xff] %vm257_vm9, %v252_v21 }
 0x136   :  { %263 = vst.msk [vmem:[%s535_s2 + $0x28] sm:$0xff] %vm257_vm9, %v254_v7 }
 0x137   :  { %288 = vst.msk [vmem:[%s535_s2 + $0x28] sm:$0xff] %vm282_vm14, %v300_v22  ;;  %v186_v25 = vpop.xlane.xlu1 %185 }
 0x138   :  { %286 = vst.msk [vmem:[%s535_s2 + $0x18] sm:$0xff] %vm282_vm14, %v298_v23  ;;  %v196_v26 = vsub.f32 %v105_v24, %v186_v25 }
 0x13a   :  { %vm231_vm11 = vweird.f32 %v196_v26 }
 0x13b   :  { %vm239_vm13 = vmxor %vm231_vm11, %vm344_vm12 }
 0x13c   :  { %v255_v27 = vsel %vm239_vm13, %v196_v26, 0.0  ;;  %v301_v28 = vsel %vm239_vm13, 1.0, %v345_v55 }
 0x13d   :  { %264 = vst.msk [vmem:[%s535_s2 + $0x30] sm:$0xff] %vm257_vm9, %v255_v27 }
 0x13e   :  { %289 = vst.msk [vmem:[%s535_s2 + $0x30] sm:$0xff] %vm282_vm14, %v301_v28 }

</bundles_post_ra>
